<compile_context>
chip_gen: v7x
topology: tpu7x:2x2x1
jax: 0.10.0
libtpu: 0.0.40
codegen_flags: <defaults>
</compile_context>

<pallas_src>
import jax
import jax.numpy as jnp
import numpy as np
from jax.experimental import pallas as pl
from jax.experimental.pallas import tpu as pltpu

HIDDEN_SIZE = 64
INPUT_SIZE = 2


def peephole_lstm_kernel(x_ref, h_ref, c_ref, wx_ref, wh_ref, wc_ref, out_ref):
    H = c_ref.shape[1]

    x = x_ref[...].astype(jnp.float32)      # [B, I]
    h = h_ref[...].astype(jnp.float32)      # [B, H]
    c = c_ref[...].astype(jnp.float32)      # [B, H]

    # Fused gate pre-activations: one [B, 4H] slab, gate order f, i, g, o.
    z = (jnp.dot(x, wx_ref[...], preferred_element_type=jnp.float32) +
         jnp.dot(h, wh_ref[...], preferred_element_type=jnp.float32))

    # Peephole vectors, loaded once (rows: cf, ci, co) and sliced in-register.
    wc = wc_ref[...].astype(jnp.float32)    # [3, H]
    w_cf = wc[0:1, :]                       # [1, H] broadcasts over batch
    w_ci = wc[1:2, :]
    w_co = wc[2:3, :]

    forget_gate = jax.nn.sigmoid(z[:, 0 * H:1 * H] + c * w_cf)
    input_gate = jax.nn.sigmoid(z[:, 1 * H:2 * H] + c * w_ci)
    cell_gate = jnp.tanh(z[:, 2 * H:3 * H])
    cell_state = forget_gate * c + input_gate * cell_gate
    output_gate = jax.nn.sigmoid(z[:, 3 * H:4 * H] + cell_state * w_co)
    hidden_state = output_gate * jnp.tanh(cell_state)

    # Single lane-dense [B, 2H] store: [hidden | cell].
    out_ref[...] = jnp.concatenate(
        [hidden_state, cell_state], axis=-1).astype(out_ref.dtype)


def peephole_lstm_cell(x, h_prev, c_prev, fused_params):
    """One Peephole LSTM step. Returns (hidden_state, cell_state)."""
    B = x.shape[0]
    H = h_prev.shape[1]

    vmem = pl.BlockSpec(memory_space=pltpu.MemorySpace.VMEM)
    hc = pl.pallas_call(
        peephole_lstm_kernel,
        out_shape=jax.ShapeDtypeStruct((B, 2 * H), x.dtype),
        in_specs=[vmem] * 6,
        out_specs=vmem,
    )(x, h_prev, c_prev,
      fused_params["W_x"], fused_params["W_h"], fused_params["W_c"])
    return hc[:, :H], hc[:, H:]


def init_params(key, input_size, hidden_size):
    """Per-weight init, matching the PyTorch module's reset_parameters."""
    std = 1.0 / np.sqrt(hidden_size)
    names_and_shapes = [
        ("W_ci", (hidden_size,)),
        ("W_cf", (hidden_size,)),
        ("W_co", (hidden_size,)),
        ("W_if", (input_size, hidden_size)),
        ("W_hf", (hidden_size, hidden_size)),
        ("W_ii", (input_size, hidden_size)),
        ("W_hi", (hidden_size, hidden_size)),
        ("W_ig", (input_size, hidden_size)),
        ("W_hg", (hidden_size, hidden_size)),
        ("W_io", (input_size, hidden_size)),
        ("W_ho", (hidden_size, hidden_size)),
    ]
    params = {}
    keys = jax.random.split(key, len(names_and_shapes))
    for k, (name, shape) in zip(keys, names_and_shapes):
        params[name] = jax.random.uniform(
            k, shape, dtype=jnp.float32, minval=-std, maxval=std)
    return params


def fuse_params(params):
    """One-time fusion into the kernel's canonical layout (done at init,
    NOT per call): W_x:[I,4H], W_h:[H,4H] (gate order f,i,g,o), W_c:[3,H]."""
    w_x = jnp.concatenate(
        [params["W_if"], params["W_ii"], params["W_ig"], params["W_io"]],
        axis=-1)                                                # [I, 4H]
    w_h = jnp.concatenate(
        [params["W_hf"], params["W_hi"], params["W_hg"], params["W_ho"]],
        axis=-1)                                                # [H, 4H]
    w_c = jnp.stack(
        [params["W_cf"], params["W_ci"], params["W_co"]], axis=0)  # [3, H]
    return {"W_x": w_x, "W_h": w_h, "W_c": w_c}


def _reference(x, h_prev, c_prev, p):
    f = jax.nn.sigmoid(x @ p["W_if"] + h_prev @ p["W_hf"] + c_prev * p["W_cf"])
    i = jax.nn.sigmoid(x @ p["W_ii"] + h_prev @ p["W_hi"] + c_prev * p["W_ci"])
    g = jnp.tanh(x @ p["W_ig"] + h_prev @ p["W_hg"])
    c = f * c_prev + i * g
    o = jax.nn.sigmoid(x @ p["W_io"] + h_prev @ p["W_ho"] + c * p["W_co"])
    h = o * jnp.tanh(c)
    return h, c


if __name__ == "__main__":
    key = jax.random.PRNGKey(0)
    k_p, k_x, k_h, k_c = jax.random.split(key, 4)

    B = 8  # multiple of 8 sublanes
    params = init_params(k_p, INPUT_SIZE, HIDDEN_SIZE)
    fused = jax.tree_util.tree_map(
        jax.block_until_ready, fuse_params(params))  # one-time fusion

    x = jax.random.normal(k_x, (B, INPUT_SIZE), dtype=jnp.float32)
    h0 = jax.random.normal(k_h, (B, HIDDEN_SIZE), dtype=jnp.float32)
    c0 = jax.random.normal(k_c, (B, HIDDEN_SIZE), dtype=jnp.float32)

    h1, c1 = peephole_lstm_cell(x, h0, c0, fused)
    jax.block_until_ready((h1, c1))

    h_ref, c_ref = _reference(x, h0, c0, params)
    np.testing.assert_allclose(np.asarray(h1), np.asarray(h_ref),
                               rtol=1e-5, atol=1e-5)
    np.testing.assert_allclose(np.asarray(c1), np.asarray(c_ref),
                               rtol=1e-5, atol=1e-5)

    print("KERNEL_OK")
</pallas_src>

<mosaic_0001>
module attributes {stable_mosaic.version = 11 : i64} {
  func.func @peephole_lstm_kernel(%arg0: memref<8x2xf32, #tpu.memory_space<vmem>>, %arg1: memref<8x64xf32, #tpu.memory_space<vmem>>, %arg2: memref<8x64xf32, #tpu.memory_space<vmem>>, %arg3: memref<2x256xf32, #tpu.memory_space<vmem>>, %arg4: memref<64x256xf32, #tpu.memory_space<vmem>>, %arg5: memref<3x64xf32, #tpu.memory_space<vmem>>, %arg6: memref<8x128xf32, #tpu.memory_space<vmem>>) attributes {dimension_semantics = [], scalar_prefetch = 0 : i64, scratch_operands = 0 : i64, tpu.core_type = #tpu.core_type<tc>} {
    %c0 = arith.constant 0 : index
    %c0_0 = arith.constant 0 : index
    %0 = vector.load %arg0[%c0, %c0_0] : memref<8x2xf32, #tpu.memory_space<vmem>>, vector<8x2xf32>
    %c0_1 = arith.constant 0 : index
    %c0_2 = arith.constant 0 : index
    %1 = vector.load %arg1[%c0_1, %c0_2] : memref<8x64xf32, #tpu.memory_space<vmem>>, vector<8x64xf32>
    %c0_3 = arith.constant 0 : index
    %c0_4 = arith.constant 0 : index
    %2 = vector.load %arg2[%c0_3, %c0_4] : memref<8x64xf32, #tpu.memory_space<vmem>>, vector<8x64xf32>
    %c0_5 = arith.constant 0 : index
    %c0_6 = arith.constant 0 : index
    %3 = vector.load %arg3[%c0_5, %c0_6] : memref<2x256xf32, #tpu.memory_space<vmem>>, vector<2x256xf32>
    %cst = arith.constant dense<0.000000e+00> : vector<8x256xf32>
    %4 = tpu.matmul %0, %3, %cst {dimension_numbers = #tpu.dot_dimension_numbers<[1], [0], [0], [1], [0, 0, 1, 1], [], []>} : vector<8x2xf32>, vector<2x256xf32>, vector<8x256xf32> -> vector<8x256xf32>
    %c0_7 = arith.constant 0 : index
    %c0_8 = arith.constant 0 : index
    %5 = vector.load %arg4[%c0_7, %c0_8] : memref<64x256xf32, #tpu.memory_space<vmem>>, vector<64x256xf32>
    %cst_9 = arith.constant dense<0.000000e+00> : vector<8x256xf32>
    %6 = tpu.matmul %1, %5, %cst_9 {dimension_numbers = #tpu.dot_dimension_numbers<[1], [0], [0], [1], [0, 0, 1, 1], [], []>} : vector<8x64xf32>, vector<64x256xf32>, vector<8x256xf32> -> vector<8x256xf32>
    %7 = arith.addf %4, %6 : vector<8x256xf32>
    %c0_10 = arith.constant 0 : index
    %c0_11 = arith.constant 0 : index
    %8 = vector.load %arg5[%c0_10, %c0_11] : memref<3x64xf32, #tpu.memory_space<vmem>>, vector<3x64xf32>
    %9 = vector.extract_strided_slice %8 {offsets = [0, 0], sizes = [1, 64], strides = [1, 1]} : vector<3x64xf32> to vector<1x64xf32>
    %10 = vector.extract_strided_slice %8 {offsets = [1, 0], sizes = [1, 64], strides = [1, 1]} : vector<3x64xf32> to vector<1x64xf32>
    %11 = vector.extract_strided_slice %8 {offsets = [2, 0], sizes = [1, 64], strides = [1, 1]} : vector<3x64xf32> to vector<1x64xf32>
    %12 = vector.extract_strided_slice %7 {offsets = [0, 0], sizes = [8, 64], strides = [1, 1]} : vector<8x256xf32> to vector<8x64xf32>
    %13 = vector.broadcast %9 : vector<1x64xf32> to vector<8x64xf32>
    %14 = arith.mulf %2, %13 : vector<8x64xf32>
    %15 = arith.addf %12, %14 : vector<8x64xf32>
    %16 = arith.negf %15 : vector<8x64xf32>
    %17 = math.exp %16 : vector<8x64xf32>
    %cst_12 = arith.constant 1.000000e+00 : f32
    %18 = vector.broadcast %cst_12 : f32 to vector<8x64xf32>
    %19 = arith.addf %18, %17 : vector<8x64xf32>
    %20 = arith.divf %18, %19 : vector<8x64xf32>
    %21 = vector.extract_strided_slice %7 {offsets = [0, 64], sizes = [8, 64], strides = [1, 1]} : vector<8x256xf32> to vector<8x64xf32>
    %22 = vector.broadcast %10 : vector<1x64xf32> to vector<8x64xf32>
    %23 = arith.mulf %2, %22 : vector<8x64xf32>
    %24 = arith.addf %21, %23 : vector<8x64xf32>
    %25 = arith.negf %24 : vector<8x64xf32>
    %26 = math.exp %25 : vector<8x64xf32>
    %cst_13 = arith.constant 1.000000e+00 : f32
    %27 = vector.broadcast %cst_13 : f32 to vector<8x64xf32>
    %28 = arith.addf %27, %26 : vector<8x64xf32>
    %29 = arith.divf %27, %28 : vector<8x64xf32>
    %30 = vector.extract_strided_slice %7 {offsets = [0, 128], sizes = [8, 64], strides = [1, 1]} : vector<8x256xf32> to vector<8x64xf32>
    %31 = math.tanh %30 : vector<8x64xf32>
    %32 = arith.mulf %20, %2 : vector<8x64xf32>
    %33 = arith.mulf %29, %31 : vector<8x64xf32>
    %34 = arith.addf %32, %33 : vector<8x64xf32>
    %35 = vector.extract_strided_slice %7 {offsets = [0, 192], sizes = [8, 64], strides = [1, 1]} : vector<8x256xf32> to vector<8x64xf32>
    %36 = vector.broadcast %11 : vector<1x64xf32> to vector<8x64xf32>
    %37 = arith.mulf %34, %36 : vector<8x64xf32>
    %38 = arith.addf %35, %37 : vector<8x64xf32>
    %39 = arith.negf %38 : vector<8x64xf32>
    %40 = math.exp %39 : vector<8x64xf32>
    %cst_14 = arith.constant 1.000000e+00 : f32
    %41 = vector.broadcast %cst_14 : f32 to vector<8x64xf32>
    %42 = arith.addf %41, %40 : vector<8x64xf32>
    %43 = arith.divf %41, %42 : vector<8x64xf32>
    %44 = math.tanh %34 : vector<8x64xf32>
    %45 = arith.mulf %43, %44 : vector<8x64xf32>
    %46 = tpu.concatenate %45, %34 in 1 : vector<8x64xf32>, vector<8x64xf32> -> vector<8x128xf32>
    %c0_15 = arith.constant 0 : index
    %c0_16 = arith.constant 0 : index
    %47 = vector.load %arg6[%c0_15, %c0_16] : memref<8x128xf32, #tpu.memory_space<vmem>>, vector<8x128xf32>
    tpu.vector_store %arg6[%c0_15, %c0_16], %46 {strides = array<i32>} : memref<8x128xf32, #tpu.memory_space<vmem>>, vector<8x128xf32>,
    return
  }
}

</mosaic_0001>

<bundles_post_ra>
// kernel: tpu_custom_call.1
= control target key start
LH: loop header
LB: loop body
LE: loop exit
PB: predicated region body
PF: predicated region fallthrough
CT: control target
= control target key end

     0   :  { %11 = vsyncpa [#allocation3], 0  ;;  %s502_s0 = inlined_call_operand.vmem [shape: f32[8,2], index: 0, kind: input, shape index: {}]   ;;  %s503_s1 = inlined_call_operand.vmem [shape: f32[8,64], index: 1, kind: input, shape index: {}]   ;;  %s504_s2 = inlined_call_operand.vmem [shape: f32[8,64], index: 2, kind: input, shape index: {}]   ;;  %s505_s3 = inlined_call_operand.vmem [shape: f32[2,256], index: 3, kind: input, shape index: {}]   ;;  %s506_s4 = inlined_call_operand.hbm [shape: f32[64,256], index: 4, kind: input, shape index: {}]   ;;  %s507_s5 = inlined_call_operand.vmem [shape: f32[3,64], index: 5, kind: input, shape index: {}]   ;;  %s508_s6 = inlined_call_operand.hbm [shape: f32[8,128], index: 6, kind: output, shape index: {}]  }
   0x1   :  { %12 = vsyncpa [#allocation4], 0  ;;  %s406_s21 = smov [#allocation2]   ;;  %s358_s25 = scalar_lea.hbm %s506_s4, 2048 }
   0x2   :  { %s26_s22 = sshll.u32 %s406_s21, 4  ;;  %p359_p0 = scmp.ne.s32.totalorder %s506_s4, %s358_s25  ;;  %s27_s22 = int_to_ptr.vmem [resolvable:$true] %s26_s22 }
   0x3   :  { %p362_p1 = scmp.lt.u32.totalorder %s358_s25, %s506_s4 }
   0x5   :  { %p364_p2 = pnand %p362_p1, %p359_p0 }
   0x7   :  { %367 = shalt.err (!%p364_p2)
}
   0x8   :  { %s368_s30 = scalar_lea.vmem %s27_s22, 2048  ;;  %p373_p4 = scmp.lt.s32.totalorder %s27_s22, %s27_s22 }
   0x9   :  { %p369_p3 = scmp.ne.s32.totalorder %s27_s22, %s368_s30  ;;  %p374_p5 = scmp.lt.s32.totalorder %s368_s30, %s368_s30 }
   0xb   :  { %p375_p6 = por %p374_p5, %p373_p4 }
   0xd   :  { %p376_p7 = pnand %p375_p6, %p369_p3 }
   0xf   :  { %379 = shalt.err (!%p376_p7)
}
  0x10   :  { %s407_s7 = smov 256   ;;  %s408_s8 = smov 16  }
  0x11   :  { %32 = dma.hbm_to_vmem [thread:$0]  %s506_s4, 2048, %s27_s22, [#allocation3], %s407_s7, %s407_s7, %s408_s8  }
  0x12   :  { %402 = dma.done.wait [#allocation3], 2048  }
  0x13   :  { %403 = vsyncadd [#allocation3], 4294965248  ;;  %v409_v0 = vmov 0.0   ;;  %v223_v1 = vlaneseq  ;;  %v43_v3 = vld [vmem:[#allocation2 + $0x8] sm:$0xff]  ;;  %v45_v4 = vld [vmem:[#allocation2 + $0x18] sm:$0xff]  ;;  %vm146_vm0 = vcmask 1041408  }
  0x14   :  { %215 = vmatprep.mubr.f32.mxu0 %v409_v0  ;;  %126 = vmatprep.mubr.f32.mxu1 %v409_v0  ;;  %v42_v5 = vld [vmem:[#allocation2] sm:$0xff]  ;;  %v318_v6 = vpack.c.bf16 %v45_v4, %v43_v3  ;;  %v44_v7 = vld [vmem:[#allocation2 + $0x10] sm:$0xff]  ;;  %v47_v8 = vld [vmem:[#allocation2 + $0x28] sm:$0xff]  ;;  %vm142_vm1 = vcmask 15360   ;;  %vm58_vm2 = vcmask 523264  }
  0x15   :  { %v459_v2 = vshrl.u32 %v223_v1, 7  ;;  %v49_v9 = vld [vmem:[#allocation2 + $0x38] sm:$0xff]  ;;  %v320_v10 = vpack.c.bf16 %v44_v7, %v42_v5  ;;  %v46_v12 = vld [vmem:[#allocation2 + $0x20] sm:$0xff]  ;;  %v48_v13 = vld [vmem:[#allocation2 + $0x30] sm:$0xff] }
  0x16   :  { %v322_v11 = vpack.c.bf16 %v49_v9, %v47_v8  ;;  %v51_v14 = vld [vmem:[#allocation2 + $0x48] sm:$0xff]  ;;  %319 = vmatprep.subr.bf16.mxu1 %v318_v6  ;;  %v53_v15 = vld [vmem:[#allocation2 + $0x58] sm:$0xff]  ;;  %v324_v17 = vpack.c.bf16 %v48_v13, %v46_v12  ;;  %v50_v18 = vld [vmem:[#allocation2 + $0x40] sm:$0xff] }
  0x17   :  { %v237_v16 = vsub.s32 1, %v459_v2  ;;  %321 = vmatpush1.bf16.msra.mxu1 %v320_v10  ;;  %v326_v19 = vpack.c.bf16 %v53_v15, %v51_v14  ;;  %v52_v20 = vld [vmem:[#allocation2 + $0x50] sm:$0xff]  ;;  %v55_v21 = vld [vmem:[#allocation2 + $0x68] sm:$0xff]  ;;  %v57_v23 = vld [vmem:[#allocation2 + $0x78] sm:$0xff]  ;;  %v225_v51 = vsub.s32 0, %v459_v2  ;;  %v265_v58 = vsub.s32 2, %v459_v2 }
  0x18   :  { %323 = vmatprep.subr.bf16.mxu1 %v322_v11  ;;  %v311_v22 = vld.sshfl [vmem:[%s505_s3] sm:$0x33 pattern:$0x76325410]  ;;  %v328_v29 = vpack.c.bf16 %v52_v20, %v50_v18  ;;  %v330_v30 = vpack.c.bf16 %v57_v23, %v55_v21  ;;  %v56_v32 = vld [vmem:[#allocation2 + $0x70] sm:$0xff] }
  0x19   :  { %v141_v24 = vcombine.high %v311_v22, %v311_v22  ;;  %v40_v25 = vld [vmem:[%s504_s2] sm:$0xff]  ;;  %s410_s2 = smov 64  }
  0x1a   :  { %v222_v26 = vld [vmem:[%s507_s5] sm:$0x7] }
  0x1b   :  { %v38_v27 = vld [vmem:[%s502_s0] sm:$0xff]  ;;  %v238_v28 = vrot.slane %v222_v26, %v237_v16  ;;  %325 = vmatpush1.bf16.msra.mxu1 %v324_v17  ;;  %312 = vmatprep.subr.msk.mxu0 %vm146_vm0, %v141_v24  ;;  %v226_v52 = vrot.slane %v222_v26, %v225_v51  ;;  %v266_v61 = vrot.slane %v222_v26, %v265_v58 }
  0x1c   :  { %327 = vmatprep.subr.bf16.mxu1 %v326_v19  ;;  %v54_v31 = vld [vmem:[#allocation2 + $0x60] sm:$0xff]  ;;  %313 = vmatpush1.msk.msra.mxu0 %vm146_vm0, %v311_v22 }
  0x1d   :  { %v239_v33 = vmul.f32 %v238_v28, %v40_v25  ;;  %314 = vmatmul.mubr.msk.f32.vlgmr.msra.gmra.mrb[0].mxu0 %vm142_vm1, %v38_v27  ;;  %v332_v34 = vpack.c.bf16 %v56_v32, %v54_v31  ;;  %v39_v35 = vld [vmem:[%s503_s1] sm:$0xff]  ;;  %v227_v53 = vmul.f32 %v226_v52, %v40_v25  ;;  %s411_s1 = smov [#allocation5]  }
  0x1e   :  { %s301_s5 = sshll.u32 %s411_s1, 4  ;;  %s302_s5 = int_to_ptr.vmem [resolvable:$true] %s301_s5 }
  0x1f   :  { %241 = vrot.lane.b32.xlu0 %v239_v33, %s410_s2  ;;  %329 = vmatpush1.bf16.msra.mxu1 %v328_v29  ;;  %s380_s18 = scalar_lea.vmem %s302_s5, 128  ;;  %p385_p9 = scmp.lt.s32.totalorder %s302_s5, %s302_s5 }
  0x20   :  { %331 = vmatprep.subr.bf16.mxu1 %v330_v30  ;;  %p381_p8 = scmp.ne.s32.totalorder %s302_s5, %s380_s18  ;;  %p386_p10 = scmp.lt.s32.totalorder %s380_s18, %s380_s18 }
  0x22   :  { %p387_p11 = por %p386_p10, %p385_p9 }
  0x23   :  { %333 = vmatpush1.bf16.msra.mxu1 %v332_v34 }
  0x24   :  { %p388_p12 = pnand %p387_p11, %p381_p8 }
  0x26   :  { %310 = vmatmul.mubr.msk.f32.vlgmr.msra.gmra.mrb[0].mxu1 %vm58_vm2, %v39_v35 }
  0x91   :  { %v242_v43 = vpop.permute.xlu0 %241 }
  0xf0   :  { %v217_v36 = vpop.f32.mrb[0].mxu0 }
  0xf1   :  { %v219_v37 = vpop.f32.mrb[1].mxu0 }
  0xf9   :  { %v128_v38 = vpop.f32.mrb[0].mxu1 }
  0xfa   :  { %v218_v39 = vadd.f32 %v217_v36, %v128_v38  ;;  %v130_v40 = vpop.f32.mrb[1].mxu1 }
  0xfb   :  { %v220_v41 = vadd.f32 %v219_v37, %v130_v40 }
  0xfc   :  { %v244_v44 = vadd.f32 %v242_v43, %v218_v39  ;;  %v228_v54 = vadd.f32 %v227_v53, %v218_v39 }
  0xfd   :  { %342 = vtanh.f32 %v220_v41 }
  0xfe   :  { %v316_v45 = vmul.f32 -1.442695, %v244_v44  ;;  %v315_v55 = vmul.f32 -1.442695, %v228_v54 }
 0x100   :  { %344 = vpow2.f32 %v316_v45 }
 0x107   :  { %v343_v42 = vpop.eup %342 }
 0x108   :  { %254 = vrot.lane.b32.xlu0 %v343_v42, %s410_s2 }
 0x10a   :  { %v345_v46 = vpop.eup %344 }
 0x10b   :  { %v248_v47 = vadd.f32 1.0, %v345_v46 }
 0x10d   :  { %346 = vrcp.f32 %v248_v47 }
 0x10e   :  { %348 = vpow2.f32 %v315_v55 }
 0x117   :  { %v347_v48 = vpop.eup %346 }
 0x118   :  { %v349_v56 = vpop.eup %348 }
 0x119   :  { %v232_v57 = vadd.f32 1.0, %v349_v56 }
 0x11b   :  { %350 = vrcp.f32 %v232_v57 }
 0x125   :  { %v351_v59 = vpop.eup %350 }
 0x126   :  { %v252_v60 = vmul.f32 %v351_v59, %v40_v25 }
 0x17a   :  { %v255_v49 = vpop.permute.xlu0 %254 }
 0x17b   :  { %v257_v50 = vmul.f32 %v347_v48, %v255_v49 }
 0x17d   :  { %259 = vrot.lane.b32.xlu1 %v257_v50, %s410_s2 }
 0x1ef   :  { %v260_v62 = vpop.permute.xlu1 %259 }
 0x1f0   :  { %v262_v63 = vadd.f32 %v260_v62, %v252_v60 }
 0x1f2   :  { %352 = vtanh.f32 %v262_v63  ;;  %v267_v0 = vmul.f32 %v266_v61, %v262_v63 }
 0x1f4   :  { %269 = vrot.lane.b32.xlu1 %v267_v0, %s410_s2 }
 0x1fc   :  { %v353_v1 = vpop.eup %352 }
 0x1fd   :  { %281 = vrot.lane.b32.xlu0 %v353_v1, %s410_s2 }
 0x201   :  { %290 = vrot.lane.b32.xlu0 %v262_v63, %s410_s2 }
 0x266   :  { %v270_v3 = vpop.permute.xlu1 %269 }
 0x267   :  { %v272_v4 = vadd.f32 %v270_v3, %v220_v41 }
 0x269   :  { %v317_v5 = vmul.f32 -1.442695, %v272_v4 }
 0x26b   :  { %354 = vpow2.f32 %v317_v5 }
 0x26f   :  { %v282_v8 = vpop.permute.xlu0 %281 }
 0x273   :  { %v291_v10 = vpop.permute.xlu0 %290 }
 0x275   :  { %v355_v6 = vpop.eup %354 }
 0x276   :  { %v276_v2 = vadd.f32 1.0, %v355_v6 }
 0x278   :  { %356 = vrcp.f32 %v276_v2 }
 0x282   :  { %v357_v7 = vpop.eup %356 }
 0x283   :  { %v284_v9 = vmul.f32 %v357_v7, %v282_v8 }
 0x285   :  { %286 = vrot.lane.b32.xlu1 %v284_v9, %s410_s2 }
 0x2f7   :  { %v287_v11 = vpop.permute.xlu1 %286 }
 0x2f8   :  { %v293_v12 = vsel %vm58_vm2, %v287_v11, %v291_v10 }
 0x2f9   :  { %294 = vst [vmem:[#allocation5] sm:$0xff] %v293_v12 }
 0x2fa   :  { %391 = shalt.err (!%p388_p12)
}
 0x2fb   :  { %s392_s21 = scalar_lea.hbm %s508_s6, 128 }
 0x2fc   :  { %p393_p13 = scmp.ne.s32.totalorder %s508_s6, %s392_s21  ;;  %p396_p0 = scmp.lt.u32.totalorder %s392_s21, %s508_s6 }
 0x2fe   :  { %p398_p1 = pnand %p396_p0, %p393_p13 }
 0x300   :  { %401 = shalt.err (!%p398_p1)
}
 0x301   :  { %304 = dma.vmem_to_hbm [thread:$0]  %s302_s5, 128, %s508_s6, [#allocation4]  }
 0x302   :  { %404 = dma.done.wait [#allocation4], 128  }
 0x303   :  { %405 = vsyncadd [#allocation4], 4294967168 }
 0x304   :  { %308 = vsyncpa [#allocation3], 1 }
 0x305   :  { %309 = vsyncpa [#allocation4], 1 }

</bundles_post_ra>
